<compile_context>
chip_gen: v7x
topology: tpu7x:2x2x1
jax: 0.10.0
libtpu: 0.0.40
codegen_flags: <defaults>
</compile_context>

<pallas_src>
import jax
import jax.numpy as jnp
from jax.experimental import pallas as pl
from jax.experimental.pallas import tpu as pltpu


def _mlp_normalize_kernel(x_ref, w1_ref, b1_ref, w2_ref, b2_ref, o_ref):
    # Two MXU matmuls (f32 accumulation), bias + ReLU on the VPU in f32,
    # L2 row-normalize via XLU reduce + EUP rsqrt.
    x = x_ref[...]                                                    # (bm, D_in)
    h = jnp.dot(x, w1_ref[...], preferred_element_type=jnp.float32)  # (bm, H) f32
    h = jnp.maximum(h + b1_ref[...], 0.0)                            # bias + ReLU
    z = jnp.dot(h.astype(w2_ref.dtype), w2_ref[...],
                preferred_element_type=jnp.float32)                  # (bm, E) f32
    z = z + b2_ref[...]
    # torch F.normalize(z, dim=1): z / max(||z||_2, eps), eps = 1e-12.
    # Equivalent: z * rsqrt(max(sum(z^2), eps^2)) -- rsqrt runs on the EUP.
    sumsq = jnp.sum(z * z, axis=-1, keepdims=True)
    inv_norm = jax.lax.rsqrt(jnp.maximum(sumsq, 1e-24))
    o_ref[...] = (z * inv_norm).astype(o_ref.dtype)


def _round_up(a, m):
    return ((a + m - 1) // m) * m


def contrastive_sensor_forward(x, w1, b1, w2, b2, *,
                               block_batch=2048,
                               compute_dtype=jnp.bfloat16,
                               out_dtype=jnp.float32,
                               vmem_limit_bytes=None):
    """Forward pass. Weights stay VMEM-resident; the batch is tiled over the grid.

    compute_dtype: dtype for the matmul inputs (default bf16). Accumulation,
                   bias, ReLU and the normalize remain f32. Pass jnp.float32
                   for full-precision matmuls.
    out_dtype:     output dtype (default f32; bf16 halves the HBM write if the
                   downstream cosine-similarity tolerates it).
    block_batch:   max rows per grid step (keep it a multiple of 256). On v5e
                   keep <= 2048 or raise vmem_limit_bytes (16 MiB scoped default).
    """
    B, D_in = x.shape
    H = w1.shape[1]
    E = w2.shape[1]

    if compute_dtype is not None:
        x = x.astype(compute_dtype)
        w1 = w1.astype(compute_dtype)
        w2 = w2.astype(compute_dtype)
    b1_2d = b1.astype(jnp.float32).reshape(1, H)
    b2_2d = b2.astype(jnp.float32).reshape(1, E)

    # Batch-tile selection:
    #  * sub-32-bit compute packs 2 rows/sublane -> 16-row alignment (else 8);
    #  * cap at ceil(B/2) rounded to 256 so a large batch never collapses to a
    #    single grid step (keeps v7x's second TensorCore busy via "parallel");
    #  * never exceed the (alignment-rounded) batch for tiny inputs.
    mult = 16 if jnp.dtype(x.dtype).itemsize < 4 else 8
    bm = min(block_batch, _round_up(pl.cdiv(B, 2), 256))
    bm = min(bm, _round_up(B, mult))
    bm = max(_round_up(bm, mult), mult)

    # Ragged last tile: Pallas masks out-of-bounds rows on the output write,
    # and every row of this computation is independent, so no pad/slice needed.
    grid = (pl.cdiv(B, bm),)

    # Weights / biases have constant index maps -> single-buffer them.
    resident = dict(pipeline_mode=pl.Buffered(1))

    out = pl.pallas_call(
        _mlp_normalize_kernel,
        out_shape=jax.ShapeDtypeStruct((B, E), out_dtype),
        grid_spec=pltpu.PrefetchScalarGridSpec(
            num_scalar_prefetch=0,
            grid=grid,
            in_specs=[
                pl.BlockSpec((bm, D_in), lambda i: (i, 0)),           # x tile (pipelined)
                pl.BlockSpec((D_in, H), lambda i: (0, 0), **resident),  # W1 (resident)
                pl.BlockSpec((1, H), lambda i: (0, 0), **resident),     # b1 (resident)
                pl.BlockSpec((H, E), lambda i: (0, 0), **resident),     # W2 (resident)
                pl.BlockSpec((1, E), lambda i: (0, 0), **resident),     # b2 (resident)
            ],
            out_specs=pl.BlockSpec((bm, E), lambda i: (i, 0)),  # lane-dense (E = 128)
        ),
        compiler_params=pltpu.CompilerParams(
            dimension_semantics=("parallel",),   # shard batch tiles across TCs (v7x)
            vmem_limit_bytes=vmem_limit_bytes,
        ),
    )(x, w1, b1_2d, w2, b2_2d)
    return out


def init_params(key, input_dim, hidden_dim=256, embedding_dim=128):
    """Deterministic init mimicking torch.nn.Linear's U(-1/sqrt(fan_in), +1/sqrt(fan_in))."""
    k1, k2, k3, k4 = jax.random.split(key, 4)
    lim1 = 1.0 / jnp.sqrt(input_dim)
    lim2 = 1.0 / jnp.sqrt(hidden_dim)
    w1 = jax.random.uniform(k1, (input_dim, hidden_dim), jnp.float32, -lim1, lim1)
    b1 = jax.random.uniform(k2, (hidden_dim,), jnp.float32, -lim1, lim1)
    w2 = jax.random.uniform(k3, (hidden_dim, embedding_dim), jnp.float32, -lim2, lim2)
    b2 = jax.random.uniform(k4, (embedding_dim,), jnp.float32, -lim2, lim2)
    return w1, b1, w2, b2


# TODO(synk): contrastive_loss (cross-entropy over z1 @ z2.T) is a training-time
# loss, not part of forward(); intentionally not implemented as a kernel.

if __name__ == "__main__":
    D_IN, HID, EMB = 16, 256, 128

    key = jax.random.PRNGKey(0)
    kx1, kx2, kp = jax.random.split(key, 3)
    w1, b1, w2, b2 = init_params(kp, D_IN, HID, EMB)

    def ref_forward(x):
        # precision="highest" so the XLA reference uses true-f32 matmuls
        # (matches torch semantics; default TPU precision would be bf16).
        h = jnp.maximum(jnp.dot(x, w1, precision="highest") + b1, 0.0)
        z = jnp.dot(h, w2, precision="highest") + b2
        n = jnp.sqrt(jnp.sum(z * z, axis=1, keepdims=True))
        return z / jnp.maximum(n, 1e-12)

    # ---- check 1: small batch, f32 matmul path, tight tolerance --------------
    B1 = 64
    x1 = jax.random.normal(kx1, (B1, D_IN), jnp.float32)
    out1 = jax.block_until_ready(
        contrastive_sensor_forward(x1, w1, b1, w2, b2, compute_dtype=jnp.float32))
    ref1 = ref_forward(x1)
    assert out1.shape == (B1, EMB)
    assert jnp.allclose(out1, ref1, atol=1e-4, rtol=1e-4)
    assert jnp.allclose(jnp.linalg.norm(out1, axis=1), 1.0, atol=1e-5)

    # ---- check 2: ragged batch, default bf16 matmuls, 2-step grid ------------
    B2 = 300  # not a multiple of 256 -> exercises the masked last tile; grid = 2
    x2 = jax.random.normal(kx2, (B2, D_IN), jnp.float32)
    out2 = jax.block_until_ready(
        contrastive_sensor_forward(x2, w1, b1, w2, b2, block_batch=256))
    ref2 = ref_forward(x2)
    assert out2.shape == (B2, EMB)
    # bf16 matmul inputs -> loosened elementwise tolerance; norms stay ~1 (f32 normalize).
    assert jnp.allclose(out2, ref2, atol=2e-2, rtol=2e-2)
    assert jnp.allclose(jnp.linalg.norm(out2, axis=1), 1.0, atol=1e-3)

    print("KERNEL_OK")
</pallas_src>

<mosaic_0001>
module attributes {stable_mosaic.version = 11 : i64} {
  func.func @_mlp_normalize_kernel(%arg0: i32, %arg1: memref<64x16xf32, #tpu.memory_space<vmem>>, %arg2: memref<16x256xf32, #tpu.memory_space<vmem>>, %arg3: memref<1x256xf32, #tpu.memory_space<vmem>>, %arg4: memref<256x128xf32, #tpu.memory_space<vmem>>, %arg5: memref<1x128xf32, #tpu.memory_space<vmem>>, %arg6: memref<64x128xf32, #tpu.memory_space<vmem>>) attributes {dimension_semantics = [#tpu.dimension_semantics<parallel>], iteration_bounds = array<i64: 1>, scalar_prefetch = 0 : i64, scratch_operands = 0 : i64, tpu.core_type = #tpu.core_type<tc>, window_params = [{transform_indices = @transform_0, window_bounds = array<i64: 64, 16>}, {pipeline_mode = #tpu.pipeline_mode<synchronous>, transform_indices = @transform_1, window_bounds = array<i64: 16, 256>}, {pipeline_mode = #tpu.pipeline_mode<synchronous>, transform_indices = @transform_2, window_bounds = array<i64: 1, 256>}, {pipeline_mode = #tpu.pipeline_mode<synchronous>, transform_indices = @transform_3, window_bounds = array<i64: 256, 128>}, {pipeline_mode = #tpu.pipeline_mode<synchronous>, transform_indices = @transform_4, window_bounds = array<i64: 1, 128>}, {transform_indices = @transform_5, window_bounds = array<i64: 64, 128>}]} {
    %c0 = arith.constant 0 : index
    %c0_0 = arith.constant 0 : index
    %0 = vector.load %arg1[%c0, %c0_0] : memref<64x16xf32, #tpu.memory_space<vmem>>, vector<64x16xf32>
    %c0_1 = arith.constant 0 : index
    %c0_2 = arith.constant 0 : index
    %1 = vector.load %arg2[%c0_1, %c0_2] : memref<16x256xf32, #tpu.memory_space<vmem>>, vector<16x256xf32>
    %cst = arith.constant dense<0.000000e+00> : vector<64x256xf32>
    %2 = tpu.matmul %0, %1, %cst {dimension_numbers = #tpu.dot_dimension_numbers<[1], [0], [0], [1], [0, 0, 1, 1], [], []>} : vector<64x16xf32>, vector<16x256xf32>, vector<64x256xf32> -> vector<64x256xf32>
    %c0_3 = arith.constant 0 : index
    %c0_4 = arith.constant 0 : index
    %3 = vector.load %arg3[%c0_3, %c0_4] : memref<1x256xf32, #tpu.memory_space<vmem>>, vector<1x256xf32>
    %4 = vector.broadcast %3 : vector<1x256xf32> to vector<64x256xf32>
    %5 = arith.addf %2, %4 : vector<64x256xf32>
    %cst_5 = arith.constant 0.000000e+00 : f32
    %6 = vector.broadcast %cst_5 : f32 to vector<64x256xf32>
    %7 = arith.maximumf %5, %6 : vector<64x256xf32>
    %c0_6 = arith.constant 0 : index
    %c0_7 = arith.constant 0 : index
    %8 = vector.load %arg4[%c0_6, %c0_7] : memref<256x128xf32, #tpu.memory_space<vmem>>, vector<256x128xf32>
    %cst_8 = arith.constant dense<0.000000e+00> : vector<64x128xf32>
    %9 = tpu.matmul %7, %8, %cst_8 {dimension_numbers = #tpu.dot_dimension_numbers<[1], [0], [0], [1], [0, 0, 1, 1], [], []>} : vector<64x256xf32>, vector<256x128xf32>, vector<64x128xf32> -> vector<64x128xf32>
    %c0_9 = arith.constant 0 : index
    %c0_10 = arith.constant 0 : index
    %10 = vector.load %arg5[%c0_9, %c0_10] : memref<1x128xf32, #tpu.memory_space<vmem>>, vector<1x128xf32>
    %11 = vector.broadcast %10 : vector<1x128xf32> to vector<64x128xf32>
    %12 = arith.addf %9, %11 : vector<64x128xf32>
    %13 = arith.mulf %12, %12 : vector<64x128xf32>
    %cst_11 = arith.constant dense<0.000000e+00> : vector<64xf32>
    %14 = vector.multi_reduction <add>, %13, %cst_11 [1] : vector<64x128xf32> to vector<64xf32>
    %15 = vector.shape_cast %14 : vector<64xf32> to vector<64x1xf32>
    %cst_12 = arith.constant 1.000000e-24 : f32
    %16 = vector.broadcast %cst_12 : f32 to vector<64x1xf32>
    %17 = arith.maximumf %15, %16 : vector<64x1xf32>
    %18 = math.rsqrt %17 : vector<64x1xf32>
    %19 = vector.broadcast %18 : vector<64x1xf32> to vector<64x128xf32>
    %20 = arith.mulf %12, %19 : vector<64x128xf32>
    %c0_13 = arith.constant 0 : index
    %c0_14 = arith.constant 0 : index
    %21 = vector.load %arg6[%c0_13, %c0_14] : memref<64x128xf32, #tpu.memory_space<vmem>>, vector<64x128xf32>
    tpu.vector_store %arg6[%c0_13, %c0_14], %20 {strides = array<i32>} : memref<64x128xf32, #tpu.memory_space<vmem>>, vector<64x128xf32>,
    return
  }
  func.func @transform_0(%arg0: i32) -> (i32, i32) {
    %c0_i32 = arith.constant 0 : i32
    %c0_i32_0 = arith.constant 0 : i32
    return %arg0, %c0_i32 : i32, i32
  }
  func.func @transform_1(%arg0: i32) -> (i32, i32) {
    %c0_i32 = arith.constant 0 : i32
    %c0_i32_0 = arith.constant 0 : i32
    %c0_i32_1 = arith.constant 0 : i32
    return %c0_i32, %c0_i32_0 : i32, i32
  }
  func.func @transform_2(%arg0: i32) -> (i32, i32) {
    %c0_i32 = arith.constant 0 : i32
    %c0_i32_0 = arith.constant 0 : i32
    %c0_i32_1 = arith.constant 0 : i32
    return %c0_i32, %c0_i32_0 : i32, i32
  }
  func.func @transform_3(%arg0: i32) -> (i32, i32) {
    %c0_i32 = arith.constant 0 : i32
    %c0_i32_0 = arith.constant 0 : i32
    %c0_i32_1 = arith.constant 0 : i32
    return %c0_i32, %c0_i32_0 : i32, i32
  }
  func.func @transform_4(%arg0: i32) -> (i32, i32) {
    %c0_i32 = arith.constant 0 : i32
    %c0_i32_0 = arith.constant 0 : i32
    %c0_i32_1 = arith.constant 0 : i32
    return %c0_i32, %c0_i32_0 : i32, i32
  }
  func.func @transform_5(%arg0: i32) -> (i32, i32) {
    %c0_i32 = arith.constant 0 : i32
    %c0_i32_0 = arith.constant 0 : i32
    return %arg0, %c0_i32 : i32, i32
  }
}

</mosaic_0001>

<bundles_post_ra>
// kernel: tpu_custom_call.1
= control target key start
LH: loop header
LB: loop body
LE: loop exit
PB: predicated region body
PF: predicated region fallthrough
CT: control target
= control target key end

     0   :  { %10 = vsyncpa [#allocation3], 0  ;;  %s739_s0 = inlined_call_operand.vmem [shape: f32[64,16], index: 0, kind: input, shape index: {}]   ;;  %s740_s1 = inlined_call_operand.vmem [shape: f32[16,256], index: 1, kind: input, shape index: {}]   ;;  %s741_s2 = inlined_call_operand.vmem [shape: f32[1,256], index: 2, kind: input, shape index: {}]   ;;  %s742_s3 = inlined_call_operand.hbm [shape: f32[256,128], index: 3, kind: input, shape index: {}]   ;;  %s743_s4 = inlined_call_operand.vmem [shape: f32[1,128], index: 4, kind: input, shape index: {}]   ;;  %s744_s5 = inlined_call_operand.hbm [shape: f32[64,128], index: 5, kind: output, shape index: {}]  }
   0x1   :  { %11 = vsyncpa [#allocation4], 0  ;;  %s616_s18 = smov [#allocation2]   ;;  %s568_s22 = scalar_lea.hbm %s742_s3, 4096 }
   0x2   :  { %s23_s19 = sshll.u32 %s616_s18, 4  ;;  %p569_p0 = scmp.ne.s32.totalorder %s742_s3, %s568_s22  ;;  %s24_s19 = int_to_ptr.vmem [resolvable:$true] %s23_s19 }
   0x3   :  { %p572_p1 = scmp.lt.u32.totalorder %s568_s22, %s742_s3 }
   0x5   :  { %p574_p2 = pnand %p572_p1, %p569_p0 }
   0x7   :  { %577 = shalt.err (!%p574_p2)
}
   0x8   :  { %s578_s27 = scalar_lea.vmem %s24_s19, 4096  ;;  %p583_p4 = scmp.lt.s32.totalorder %s24_s19, %s24_s19 }
   0x9   :  { %p579_p3 = scmp.ne.s32.totalorder %s24_s19, %s578_s27  ;;  %p584_p5 = scmp.lt.s32.totalorder %s578_s27, %s578_s27 }
   0xb   :  { %p585_p6 = por %p584_p5, %p583_p4 }
   0xd   :  { %p586_p7 = pnand %p585_p6, %p579_p3 }
   0xf   :  { %589 = shalt.err (!%p586_p7)
}
  0x10   :  { %s617_s28 = smov 128   ;;  %s618_s29 = smov 8  }
  0x11   :  { %29 = dma.hbm_to_vmem [thread:$0]  %s742_s3, 4096, %s24_s19, [#allocation3], %s617_s28, %s617_s28, %s618_s29  }
  0x12   :  { %612 = dma.done.wait [#allocation3], 4096  }
  0x13   :  { %613 = vsyncadd [#allocation3], 4294963200  ;;  %v619_v0 = vmov 0.0   ;;  %v44_v1 = vld [vmem:[%s740_s1 + $0x8] sm:$0xff]  ;;  %v46_v2 = vld [vmem:[%s740_s1 + $0x18] sm:$0xff]  ;;  %vm59_vm0 = vcmask 130048   ;;  %v49_v63 = vlaneseq }
  0x14   :  { %148 = vmatprep.mubr.f32.mxu0 %v619_v0  ;;  %v43_v3 = vld [vmem:[%s740_s1] sm:$0xff]  ;;  %v495_v4 = vpack.c.bf16 %v46_v2, %v44_v1  ;;  %v45_v5 = vld [vmem:[%s740_s1 + $0x10] sm:$0xff]  ;;  %v230_v9 = vld [vmem:[#allocation2 + $0x88] sm:$0xff] }
  0x15   :  { %v497_v6 = vpack.c.bf16 %v45_v5, %v43_v3  ;;  %v35_v7 = vld [vmem:[%s739_s0] sm:$0xff]  ;;  %v214_v12 = vld [vmem:[#allocation2 + $0x8] sm:$0xff]  ;;  %v231_v13 = vld [vmem:[#allocation2 + $0x90] sm:$0xff] }
  0x16   :  { %496 = vmatprep.subr.bf16.mxu0 %v495_v4  ;;  %v229_v8 = vld [vmem:[#allocation2 + $0x80] sm:$0xff]  ;;  %v232_v14 = vld [vmem:[#allocation2 + $0x98] sm:$0xff]  ;;  %v215_v17 = vld [vmem:[#allocation2 + $0x10] sm:$0xff] }
  0x17   :  { %498 = vmatpush1.bf16.msra.mxu0 %v497_v6  ;;  %v213_v10 = vld [vmem:[#allocation2] sm:$0xff]  ;;  %v499_v11 = vpack.c.bf16 %v230_v9, %v229_v8  ;;  %v503_v16 = vpack.c.bf16 %v232_v14, %v231_v13  ;;  %v216_v18 = vld [vmem:[#allocation2 + $0x18] sm:$0xff]  ;;  %v234_v20 = vld [vmem:[#allocation2 + $0xa8] sm:$0xff] }
  0x18   :  { %v501_v15 = vpack.c.bf16 %v214_v12, %v213_v10  ;;  %v233_v19 = vld [vmem:[#allocation2 + $0xa0] sm:$0xff]  ;;  %v36_v21 = vld [vmem:[%s739_s0 + $0x8] sm:$0xff]  ;;  %v505_v22 = vpack.c.bf16 %v216_v18, %v215_v17  ;;  %v235_v26 = vld [vmem:[#allocation2 + $0xb0] sm:$0xff] }
  0x19   :  { %500 = vmatprep.subr.bf16.mxu0 %v499_v11  ;;  %v507_v23 = vpack.c.bf16 %v234_v20, %v233_v19  ;;  %v217_v24 = vld [vmem:[#allocation2 + $0x20] sm:$0xff]  ;;  %v218_v25 = vld [vmem:[#allocation2 + $0x28] sm:$0xff]  ;;  %531 = vmatprep.subr.bf16.mxu1 %v499_v11  ;;  %v236_v27 = vld [vmem:[#allocation2 + $0xb8] sm:$0xff] }
  0x1a   :  { %430 = vmatmul.mubr.msk.f32.vlgmr.msra.gmra.mrb[0].mxu0 %vm59_vm0, %v35_v7  ;;  %539 = vmatpush3.bf16.msra.mxu1 %v501_v15  ;;  %v37_v28 = vld [vmem:[%s739_s0 + $0x10] sm:$0xff]  ;;  %v509_v29 = vpack.c.bf16 %v218_v25, %v217_v24  ;;  %v511_v30 = vpack.c.bf16 %v236_v27, %v235_v26  ;;  %v220_v32 = vld [vmem:[#allocation2 + $0x38] sm:$0xff]  ;;  %v237_v33 = vld [vmem:[#allocation2 + $0xc0] sm:$0xff] }
  0x1b   :  { %154 = vmatprep.mubr.f32.mxu0 %v619_v0  ;;  %502 = vmatpush3.bf16.msra.mxu0 %v501_v15  ;;  %v219_v31 = vld [vmem:[#allocation2 + $0x30] sm:$0xff]  ;;  %v238_v34 = vld [vmem:[#allocation2 + $0xc8] sm:$0xff]  ;;  %v38_v35 = vld [vmem:[%s739_s0 + $0x18] sm:$0xff] }
  0x1c   :  { %504 = vmatprep.subr.bf16.mxu0 %v503_v16  ;;  %532 = vmatprep.subr.bf16.mxu1 %v503_v16  ;;  %v513_v36 = vpack.c.bf16 %v220_v32, %v219_v31  ;;  %v515_v37 = vpack.c.bf16 %v238_v34, %v237_v33  ;;  %v221_v38 = vld [vmem:[#allocation2 + $0x40] sm:$0xff]  ;;  %v222_v39 = vld [vmem:[#allocation2 + $0x48] sm:$0xff]  ;;  %v239_v40 = vld [vmem:[#allocation2 + $0xd0] sm:$0xff] }
  0x1d   :  { %v240_v41 = vld [vmem:[#allocation2 + $0xd8] sm:$0xff]  ;;  %v39_v42 = vld [vmem:[%s739_s0 + $0x20] sm:$0xff]  ;;  %v517_v43 = vpack.c.bf16 %v222_v39, %v221_v38  ;;  %v223_v45 = vld [vmem:[#allocation2 + $0x50] sm:$0xff] }
  0x1e   :  { %431 = vmatmul.mubr.msk.f32.gmra.mrb[2].mxu0 %vm59_vm0, %v36_v21  ;;  %540 = vmatpush3.bf16.msra.mxu1 %v505_v22  ;;  %v519_v44 = vpack.c.bf16 %v240_v41, %v239_v40  ;;  %v224_v46 = vld [vmem:[#allocation2 + $0x58] sm:$0xff]  ;;  %v241_v47 = vld [vmem:[#allocation2 + $0xe0] sm:$0xff]  ;;  %v242_v48 = vld [vmem:[#allocation2 + $0xe8] sm:$0xff] }
  0x1f   :  { %160 = vmatprep.mubr.f32.mxu0 %v619_v0  ;;  %506 = vmatpush3.bf16.msra.mxu0 %v505_v22  ;;  %v40_v49 = vld [vmem:[%s739_s0 + $0x28] sm:$0xff]  ;;  %v521_v50 = vpack.c.bf16 %v224_v46, %v223_v45  ;;  %v523_v51 = vpack.c.bf16 %v242_v48, %v241_v47  ;;  %v41_v52 = vld [vmem:[%s739_s0 + $0x30] sm:$0xff]  ;;  %v42_v53 = vld [vmem:[%s739_s0 + $0x38] sm:$0xff] }
  0x20   :  { %508 = vmatprep.subr.bf16.mxu0 %v507_v23  ;;  %533 = vmatprep.subr.bf16.mxu1 %v507_v23  ;;  %v225_v54 = vld [vmem:[#allocation2 + $0x60] sm:$0xff]  ;;  %v226_v55 = vld [vmem:[#allocation2 + $0x68] sm:$0xff]  ;;  %v243_v57 = vld [vmem:[#allocation2 + $0xf0] sm:$0xff] }
  0x21   :  { %v525_v56 = vpack.c.bf16 %v226_v55, %v225_v54  ;;  %v244_v58 = vld [vmem:[#allocation2 + $0xf8] sm:$0xff]  ;;  %v227_v60 = vld [vmem:[#allocation2 + $0x70] sm:$0xff]  ;;  %v47_v2 = vld [vmem:[%s741_s2] sm:$0x3] }
  0x22   :  { %432 = vmatmul.mubr.msk.f32.gmra.mrb[4].mxu0 %vm59_vm0, %v37_v28  ;;  %541 = vmatpush3.bf16.msra.mxu1 %v509_v29  ;;  %v527_v59 = vpack.c.bf16 %v244_v58, %v243_v57  ;;  %v228_v61 = vld [vmem:[#allocation2 + $0x78] sm:$0xff] }
  0x23   :  { %166 = vmatprep.mubr.f32.mxu0 %v619_v0  ;;  %510 = vmatpush3.bf16.msra.mxu0 %v509_v29  ;;  %v529_v62 = vpack.c.bf16 %v228_v61, %v227_v60 }
  0x24   :  { %512 = vmatprep.subr.bf16.mxu0 %v511_v30  ;;  %534 = vmatprep.subr.bf16.mxu1 %v511_v30 }
  0x26   :  { %433 = vmatmul.mubr.msk.f32.gmra.mrb[6].mxu0 %vm59_vm0, %v38_v35  ;;  %542 = vmatpush3.bf16.msra.mxu1 %v513_v36 }
  0x27   :  { %172 = vmatprep.mubr.f32.mxu0 %v619_v0  ;;  %514 = vmatpush3.bf16.msra.mxu0 %v513_v36 }
  0x28   :  { %516 = vmatprep.subr.bf16.mxu0 %v515_v37  ;;  %535 = vmatprep.subr.bf16.mxu1 %v515_v37 }
  0x2a   :  { %434 = vmatmul.mubr.msk.f32.gmra.mrb[8].mxu0 %vm59_vm0, %v39_v42  ;;  %543 = vmatpush3.bf16.msra.mxu1 %v517_v43 }
  0x2b   :  { %178 = vmatprep.mubr.f32.mxu0 %v619_v0  ;;  %518 = vmatpush3.bf16.msra.mxu0 %v517_v43 }
  0x2c   :  { %520 = vmatprep.subr.bf16.mxu0 %v519_v44  ;;  %536 = vmatprep.subr.bf16.mxu1 %v519_v44 }
  0x2e   :  { %435 = vmatmul.mubr.msk.f32.gmra.mrb[10].mxu0 %vm59_vm0, %v40_v49  ;;  %544 = vmatpush3.bf16.msra.mxu1 %v521_v50 }
  0x2f   :  { %184 = vmatprep.mubr.f32.mxu0 %v619_v0  ;;  %522 = vmatpush3.bf16.msra.mxu0 %v521_v50 }
  0x30   :  { %524 = vmatprep.subr.bf16.mxu0 %v523_v51  ;;  %537 = vmatprep.subr.bf16.mxu1 %v523_v51 }
  0x32   :  { %436 = vmatmul.mubr.msk.f32.gmra.mrb[12].mxu0 %vm59_vm0, %v41_v52  ;;  %545 = vmatpush3.bf16.msra.mxu1 %v525_v56 }
  0x33   :  { %190 = vmatprep.mubr.f32.mxu0 %v619_v0  ;;  %526 = vmatpush3.bf16.msra.mxu0 %v525_v56  ;;  %v50_v0 = vshrl.u32 %v49_v63, 7  ;;  %v438_v56 = vld [vmem:[%s743_s4] ss:$0 sm:$0xff]  ;;  %s620_s4 = smov [#allocation5]  }
  0x34   :  { %528 = vmatprep.subr.bf16.mxu0 %v527_v59  ;;  %538 = vmatprep.subr.bf16.mxu1 %v527_v59  ;;  %s418_s8 = sshll.u32 %s620_s4, 4  ;;  %s419_s8 = int_to_ptr.vmem [resolvable:$true] %s418_s8 }
  0x35   :  { %v51_v1 = vsub.s32 0, %v50_v0  ;;  %v55_v3 = vsub.s32 1, %v50_v0  ;;  %s590_s9 = scalar_lea.vmem %s419_s8, 1024  ;;  %p595_p9 = scmp.lt.s32.totalorder %s419_s8, %s419_s8 }
  0x36   :  { %437 = vmatmul.mubr.msk.f32.gmra.mrb[14].mxu0 %vm59_vm0, %v42_v53  ;;  %546 = vmatpush3.bf16.msra.mxu1 %v529_v62  ;;  %p591_p8 = scmp.ne.s32.totalorder %s419_s8, %s590_s9  ;;  %p596_p10 = scmp.lt.s32.totalorder %s590_s9, %s590_s9 }
  0x37   :  { %530 = vmatpush3.bf16.msra.mxu0 %v529_v62  ;;  %v52_v4 = vrot.slane %v47_v2, %v51_v1  ;;  %v56_v5 = vrot.slane %v47_v2, %v55_v3 }
  0x38   :  { %p597_p11 = por %p596_p10, %p595_p9 }
  0x3a   :  { %p598_p12 = pnand %p597_p11, %p591_p8 }
  0xed   :  { %v150_v6 = vpop.f32.mrb[0].mxu0 }
  0xee   :  { %v151_v7 = vadd.f32 %v150_v6, %v52_v4  ;;  %v152_v8 = vpop.f32.mrb[1].mxu0 }
  0xef   :  { %v153_v9 = vadd.f32 %v152_v8, %v56_v5 }
  0xf0   :  { %v197_v12 = vmax.f32 %v151_v7, 0.0 }
  0xf1   :  { %v198_v10 = vmax.f32 %v153_v9, 0.0  ;;  %v156_v11 = vpop.f32.mrb[2].mxu0 }
  0xf2   :  { %v157_v13 = vadd.f32 %v156_v11, %v52_v4  ;;  %v158_v14 = vpop.f32.mrb[3].mxu0 }
  0xf3   :  { %v159_v15 = vadd.f32 %v158_v14, %v56_v5  ;;  %316 = vmatprep.mubr.f32.mxu0 %v198_v10 }
  0xf4   :  { %317 = vmatmul.mubr.f32.vlgmr.msra.gmra.mrb[16].mxu0 %v197_v12  ;;  %v199_v18 = vmax.f32 %v157_v13, 0.0 }
  0xf5   :  { %v200_v16 = vmax.f32 %v159_v15, 0.0  ;;  %v162_v17 = vpop.f32.mrb[4].mxu0 }
  0xf6   :  { %v163_v19 = vadd.f32 %v162_v17, %v52_v4  ;;  %v164_v20 = vpop.f32.mrb[5].mxu0 }
  0xf7   :  { %v165_v21 = vadd.f32 %v164_v20, %v56_v5  ;;  %321 = vmatprep.mubr.f32.mxu0 %v200_v16 }
  0xf8   :  { %322 = vmatmul.mubr.f32.gmra.mrb[18].mxu0 %v199_v18  ;;  %v201_v24 = vmax.f32 %v163_v19, 0.0 }
  0xf9   :  { %v202_v22 = vmax.f32 %v165_v21, 0.0  ;;  %v168_v23 = vpop.f32.mrb[6].mxu0 }
  0xfa   :  { %v169_v25 = vadd.f32 %v168_v23, %v52_v4  ;;  %v170_v26 = vpop.f32.mrb[7].mxu0 }
  0xfb   :  { %326 = vmatprep.mubr.f32.mxu0 %v202_v22  ;;  %v171_v27 = vadd.f32 %v170_v26, %v56_v5 }
  0xfc   :  { %327 = vmatmul.mubr.f32.gmra.mrb[20].mxu0 %v201_v24  ;;  %v203_v30 = vmax.f32 %v169_v25, 0.0 }
  0xfd   :  { %v174_v28 = vpop.f32.mrb[8].mxu0  ;;  %v204_v29 = vmax.f32 %v171_v27, 0.0 }
  0xfe   :  { %v175_v31 = vadd.f32 %v174_v28, %v52_v4  ;;  %v176_v32 = vpop.f32.mrb[9].mxu0 }
  0xff   :  { %v177_v33 = vadd.f32 %v176_v32, %v56_v5  ;;  %331 = vmatprep.mubr.f32.mxu1 %v204_v29 }
 0x100   :  { %332 = vmatmul.mubr.f32.vlgmr.msra.gmra.mrb[0].mxu1 %v203_v30  ;;  %v205_v36 = vmax.f32 %v175_v31, 0.0 }
 0x101   :  { %v206_v34 = vmax.f32 %v177_v33, 0.0  ;;  %v180_v35 = vpop.f32.mrb[10].mxu0 }
 0x102   :  { %v181_v37 = vadd.f32 %v180_v35, %v52_v4  ;;  %v182_v38 = vpop.f32.mrb[11].mxu0 }
 0x103   :  { %v183_v39 = vadd.f32 %v182_v38, %v56_v5  ;;  %336 = vmatprep.mubr.f32.mxu1 %v206_v34 }
 0x104   :  { %337 = vmatmul.mubr.f32.gmra.mrb[2].mxu1 %v205_v36  ;;  %v207_v42 = vmax.f32 %v181_v37, 0.0 }
 0x105   :  { %v208_v40 = vmax.f32 %v183_v39, 0.0  ;;  %v186_v41 = vpop.f32.mrb[12].mxu0 }
 0x106   :  { %v187_v43 = vadd.f32 %v186_v41, %v52_v4  ;;  %v188_v44 = vpop.f32.mrb[13].mxu0 }
 0x107   :  { %v189_v45 = vadd.f32 %v188_v44, %v56_v5  ;;  %341 = vmatprep.mubr.f32.mxu1 %v208_v40 }
 0x108   :  { %342 = vmatmul.mubr.f32.gmra.mrb[4].mxu1 %v207_v42  ;;  %v209_v48 = vmax.f32 %v187_v43, 0.0 }
 0x109   :  { %v210_v46 = vmax.f32 %v189_v45, 0.0  ;;  %v192_v47 = vpop.f32.mrb[14].mxu0 }
 0x10a   :  { %v193_v49 = vadd.f32 %v192_v47, %v52_v4  ;;  %v194_v50 = vpop.f32.mrb[15].mxu0 }
 0x10b   :  { %v195_v51 = vadd.f32 %v194_v50, %v56_v5  ;;  %346 = vmatprep.mubr.f32.mxu1 %v210_v46 }
 0x10c   :  { %347 = vmatmul.mubr.f32.gmra.mrb[6].mxu1 %v209_v48  ;;  %v211_v53 = vmax.f32 %v193_v49, 0.0 }
 0x10d   :  { %v212_v52 = vmax.f32 %v195_v51, 0.0 }
 0x10f   :  { %351 = vmatprep.mubr.f32.mxu1 %v212_v52 }
 0x110   :  { %352 = vmatmul.mubr.f32.gmra.mrb[8].mxu1 %v211_v53 }
 0x1c7   :  { %v471_v54 = vpop.f32.mrb[16].mxu0 }
 0x1c8   :  { %v472_v55 = vpop.f32.mrb[17].mxu0 }
 0x1c9   :  { %v473_v57 = vadd.f32 %v472_v55, %v471_v54 }
 0x1cb   :  { %v474_v58 = vpop.f32.mrb[18].mxu0  ;;  %v319_v59 = vadd.f32 %v473_v57, %v438_v56 }
 0x1cc   :  { %v475_v60 = vpop.f32.mrb[19].mxu0 }
 0x1cd   :  { %v476_v61 = vadd.f32 %v475_v60, %v474_v58  ;;  %v357_v62 = vmul.f32 %v319_v59, %v319_v59 }
 0x1cf   :  { %v324_v63 = vadd.f32 %v476_v61, %v438_v56  ;;  %v477_v0 = vpop.f32.mrb[20].mxu0  ;;  %365 = vadd.xlane.f32.xlu0 %v357_v62 }
 0x1d0   :  { %v478_v1 = vpop.f32.mrb[21].mxu0 }
 0x1d1   :  { %v479_v2 = vadd.f32 %v478_v1, %v477_v0  ;;  %v358_v3 = vmul.f32 %v324_v63, %v324_v63 }
 0x1d3   :  { %v480_v4 = vpop.f32.mrb[0].mxu1  ;;  %367 = vadd.xlane.f32.xlu0 %v358_v3  ;;  %v329_v5 = vadd.f32 %v479_v2, %v438_v56 }
 0x1d4   :  { %v481_v6 = vpop.f32.mrb[1].mxu1 }
 0x1d5   :  { %v482_v7 = vadd.f32 %v481_v6, %v480_v4  ;;  %v359_v8 = vmul.f32 %v329_v5, %v329_v5 }
 0x1d7   :  { %v334_v9 = vadd.f32 %v482_v7, %v438_v56  ;;  %v483_v10 = vpop.f32.mrb[2].mxu1  ;;  %369 = vadd.xlane.f32.xlu1 %v359_v8 }
 0x1d8   :  { %v484_v11 = vpop.f32.mrb[3].mxu1 }
 0x1d9   :  { %v485_v12 = vadd.f32 %v484_v11, %v483_v10  ;;  %v360_v13 = vmul.f32 %v334_v9, %v334_v9 }
 0x1db   :  { %v339_v14 = vadd.f32 %v485_v12, %v438_v56  ;;  %v486_v15 = vpop.f32.mrb[4].mxu1  ;;  %371 = vadd.xlane.f32.xlu1 %v360_v13 }
 0x1dc   :  { %v487_v16 = vpop.f32.mrb[5].mxu1 }
 0x1dd   :  { %v488_v17 = vadd.f32 %v487_v16, %v486_v15  ;;  %v361_v18 = vmul.f32 %v339_v14, %v339_v14 }
 0x1df   :  { %v344_v19 = vadd.f32 %v488_v17, %v438_v56  ;;  %v489_v20 = vpop.f32.mrb[6].mxu1  ;;  %373 = vadd.xlane.f32.xlu0 %v361_v18 }
 0x1e0   :  { %v490_v21 = vpop.f32.mrb[7].mxu1 }
 0x1e1   :  { %v491_v22 = vadd.f32 %v490_v21, %v489_v20  ;;  %v362_v23 = vmul.f32 %v344_v19, %v344_v19 }
 0x1e3   :  { %v349_v24 = vadd.f32 %v491_v22, %v438_v56  ;;  %v492_v25 = vpop.f32.mrb[8].mxu1  ;;  %375 = vadd.xlane.f32.xlu1 %v362_v23 }
 0x1e4   :  { %v493_v26 = vpop.f32.mrb[9].mxu1 }
 0x1e5   :  { %v494_v27 = vadd.f32 %v493_v26, %v492_v25  ;;  %v363_v28 = vmul.f32 %v349_v24, %v349_v24 }
 0x1e7   :  { %v354_v29 = vadd.f32 %v494_v27, %v438_v56  ;;  %377 = vadd.xlane.f32.xlu0 %v363_v28 }
 0x1e9   :  { %v364_v30 = vmul.f32 %v354_v29, %v354_v29 }
 0x1eb   :  { %379 = vadd.xlane.f32.xlu1 %v364_v30 }
 0x25c   :  { %v366_v31 = vpop.xlane.xlu0 %365 }
 0x25d   :  { %v381_v32 = vmax.f32 %v366_v31, 1e-24 }
 0x25f   :  { %552 = vrsqrt.f32 %v381_v32 }
 0x260   :  { %v368_v33 = vpop.xlane.xlu0 %367 }
 0x261   :  { %v382_v34 = vmax.f32 %v368_v33, 1e-24 }
 0x263   :  { %554 = vrsqrt.f32 %v382_v34 }
 0x264   :  { %v370_v35 = vpop.xlane.xlu1 %369 }
 0x265   :  { %v383_v36 = vmax.f32 %v370_v35, 1e-24 }
 0x267   :  { %556 = vrsqrt.f32 %v383_v36 }
 0x268   :  { %v372_v37 = vpop.xlane.xlu1 %371 }
 0x269   :  { %v553_v38 = vpop.eup %552  ;;  %v384_v39 = vmax.f32 %v372_v37, 1e-24 }
 0x26a   :  { %v397_v40 = vmul.f32 %v553_v38, %v319_v59 }
 0x26b   :  { %558 = vrsqrt.f32 %v384_v39 }
 0x26c   :  { %405 = vst [vmem:[#allocation5] sm:$0xff] %v397_v40  ;;  %v374_v41 = vpop.xlane.xlu0 %373 }
 0x26d   :  { %v555_v42 = vpop.eup %554  ;;  %v385_v43 = vmax.f32 %v374_v41, 1e-24 }
 0x26e   :  { %v398_v44 = vmul.f32 %v555_v42, %v324_v63 }
 0x26f   :  { %560 = vrsqrt.f32 %v385_v43 }
 0x270   :  { %406 = vst [vmem:[#allocation5 + $0x8] sm:$0xff] %v398_v44  ;;  %v376_v45 = vpop.xlane.xlu1 %375 }
 0x271   :  { %v557_v46 = vpop.eup %556  ;;  %v386_v47 = vmax.f32 %v376_v45, 1e-24 }
 0x272   :  { %v399_v48 = vmul.f32 %v557_v46, %v329_v5 }
 0x273   :  { %562 = vrsqrt.f32 %v386_v47 }
 0x274   :  { %407 = vst [vmem:[#allocation5 + $0x10] sm:$0xff] %v399_v48  ;;  %v378_v49 = vpop.xlane.xlu0 %377 }
 0x275   :  { %v559_v50 = vpop.eup %558  ;;  %v387_v51 = vmax.f32 %v378_v49, 1e-24 }
 0x276   :  { %v400_v52 = vmul.f32 %v559_v50, %v334_v9 }
 0x277   :  { %564 = vrsqrt.f32 %v387_v51 }
 0x278   :  { %408 = vst [vmem:[#allocation5 + $0x18] sm:$0xff] %v400_v52  ;;  %v380_v53 = vpop.xlane.xlu1 %379 }
 0x279   :  { %v561_v54 = vpop.eup %560  ;;  %v388_v55 = vmax.f32 %v380_v53, 1e-24 }
 0x27a   :  { %v401_v56 = vmul.f32 %v561_v54, %v339_v14 }
 0x27b   :  { %566 = vrsqrt.f32 %v388_v55 }
 0x27c   :  { %409 = vst [vmem:[#allocation5 + $0x20] sm:$0xff] %v401_v56 }
 0x27d   :  { %v563_v57 = vpop.eup %562 }
 0x27e   :  { %v402_v58 = vmul.f32 %v563_v57, %v344_v19 }
 0x280   :  { %410 = vst [vmem:[#allocation5 + $0x28] sm:$0xff] %v402_v58 }
 0x281   :  { %v565_v59 = vpop.eup %564 }
 0x282   :  { %v403_v60 = vmul.f32 %v565_v59, %v349_v24 }
 0x284   :  { %411 = vst [vmem:[#allocation5 + $0x30] sm:$0xff] %v403_v60 }
 0x285   :  { %v567_v61 = vpop.eup %566 }
 0x286   :  { %v404_v62 = vmul.f32 %v567_v61, %v354_v29 }
 0x288   :  { %412 = vst [vmem:[#allocation5 + $0x38] sm:$0xff] %v404_v62 }
 0x289   :  { %601 = shalt.err (!%p598_p12)
}
 0x28a   :  { %s602_s12 = scalar_lea.hbm %s744_s5, 1024 }
 0x28b   :  { %p603_p13 = scmp.ne.s32.totalorder %s744_s5, %s602_s12  ;;  %p606_p0 = scmp.lt.u32.totalorder %s602_s12, %s744_s5 }
 0x28d   :  { %p608_p1 = pnand %p606_p0, %p603_p13 }
 0x28f   :  { %611 = shalt.err (!%p608_p1)
}
 0x290   :  { %424 = dma.vmem_to_hbm [thread:$0]  %s419_s8, 1024, %s744_s5, [#allocation4], %s617_s28, %s617_s28, %s618_s29  }
 0x291   :  { %614 = dma.done.wait [#allocation4], 1024  }
 0x292   :  { %615 = vsyncadd [#allocation4], 4294966272 }
 0x293   :  { %428 = vsyncpa [#allocation3], 1 }
 0x294   :  { %429 = vsyncpa [#allocation4], 1 }

</bundles_post_ra>
